<compile_context>
chip_gen: v6e
topology: v6e:2x2x1
jax: 0.10.0
libtpu: 0.0.40
codegen_flags: <defaults>
</compile_context>

<pallas_src>
import functools

import jax
import jax.numpy as jnp
from jax.experimental import pallas as pl
from jax.experimental.pallas import tpu as pltpu


# ----------------------------- Pallas kernel --------------------------------
def _matmul_bn_act_kernel(p_ref, w_ref, shift_ref, o_ref, acc_ref, *, act):
    # p_ref:     (tm, tk)  bf16 im2col patch tile
    # w_ref:     (tk, tn)  bf16 conv weight tile (BN scale pre-folded)
    # shift_ref: (1, tn)   f32 folded BN shift = beta - mean * scale
    # o_ref:     (tm, tn)  f32 output tile
    # acc_ref:   (tm, tn)  f32 VMEM accumulator scratch
    k = pl.program_id(2)

    @pl.when(k == 0)
    def _():
        acc_ref[...] = jnp.zeros_like(acc_ref)

    acc_ref[...] += jnp.dot(p_ref[...], w_ref[...],
                            preferred_element_type=jnp.float32)

    @pl.when(k == pl.num_programs(2) - 1)
    def _():
        y = acc_ref[...] + shift_ref[...]
        if act == "relu":
            y = jnp.maximum(y, 0.0)
        elif act == "leaky_relu":
            y = jnp.where(y > 0, y, 0.01 * y)
        elif act == "sigmoid":
            y = jax.nn.sigmoid(y)
        elif act is not None:
            # TODO(synk): other torch.nn.functional activations not wired up.
            raise NotImplementedError(f"act={act}")
        o_ref[...] = y.astype(o_ref.dtype)


def _pick_tiles(M, K, Coutp):
    """MXU/VMEM-friendly tile sizes. Coutp is a multiple of 128."""
    tm = 512 if M >= 512 else M                 # full-dim block if M is small
    tn = 256 if Coutp % 256 == 0 else 128       # lane-dense output tiles
    tk = K                                      # whole K if it fits comfortably
    if K > 1024:
        for cand in (512, 384, 256, 128):       # tk < K must be 128-aligned
            if K % cand == 0:
                tk = cand
                break
    return tm, tn, tk


def _fused_matmul_bn_act(patches, w_mat, shift, act):
    """patches: (M, K) bf16, w_mat: (K, Coutp) bf16, shift: (1, Coutp) f32
    -> (M, Coutp) f32 = act(patches @ w_mat + shift)."""
    M, K = patches.shape
    Coutp = w_mat.shape[1]
    tm, tn, tk = _pick_tiles(M, K, Coutp)

    nm = pl.cdiv(M, tm)
    nn = Coutp // tn
    nk = K // tk

    cost = pl.CostEstimate(
        flops=2 * M * K * Coutp,
        transcendentals=(M * Coutp if act == "sigmoid" else 0),
        bytes_accessed=M * K * 2 + K * Coutp * 2 + M * Coutp * 4 + Coutp * 4,
    )

    return pl.pallas_call(
        functools.partial(_matmul_bn_act_kernel, act=act),
        out_shape=jax.ShapeDtypeStruct((M, Coutp), jnp.float32),
        grid_spec=pltpu.PrefetchScalarGridSpec(
            num_scalar_prefetch=0,
            grid=(nm, nn, nk),
            in_specs=[
                pl.BlockSpec((tm, tk), lambda i, j, k: (i, k)),
                pl.BlockSpec((tk, tn), lambda i, j, k: (k, j)),
                pl.BlockSpec((1, tn), lambda i, j, k: (0, j)),
            ],
            out_specs=pl.BlockSpec((tm, tn), lambda i, j, k: (i, j)),
            scratch_shapes=[pltpu.VMEM((tm, tn), jnp.float32)],
        ),
        compiler_params=pltpu.CompilerParams(
            dimension_semantics=("parallel", "parallel", "arbitrary"),
            vmem_limit_bytes=32 * 1024 * 1024,
        ),
        cost_estimate=cost,
    )(patches, w_mat, shift)


# ------------------------------ Module wrapper -------------------------------
class ConvNormLayerPallas:
    """Pallas equivalent of ConvNormLayer (dcn_v2=False, groups=1, eval BN)."""

    def __init__(self, ch_in, ch_out, filter_size, stride, groups=1,
                 act=None, norm_type="bn", key=jax.random.PRNGKey(0)):
        assert norm_type in ["bn", "sync_bn"]
        assert groups == 1  # TODO(synk): grouped conv not implemented.
        self.ch_in, self.ch_out = ch_in, ch_out
        self.f, self.s = filter_size, stride
        self.pad = (filter_size - 1) // 2
        self.act = act

        kw, kg, kb, km, kv = jax.random.split(key, 5)
        # Conv weight, PyTorch layout (Cout, Cin, fh, fw), bias=False.
        self.weight = jax.random.normal(
            kw, (ch_out, ch_in, filter_size, filter_size), jnp.float32) * 0.1
        # BatchNorm parameters / running stats (deterministic synthetic init).
        self.gamma = 1.0 + 0.1 * jax.random.normal(kg, (ch_out,), jnp.float32)
        self.beta = 0.1 * jax.random.normal(kb, (ch_out,), jnp.float32)
        self.running_mean = 0.1 * jax.random.normal(km, (ch_out,), jnp.float32)
        self.running_var = jnp.abs(
            jax.random.normal(kv, (ch_out,), jnp.float32)) + 0.5
        self.eps = 1e-5

    def __call__(self, x_nchw):
        f, s, p = self.f, self.s, self.pad
        N, C, H, W = x_nchw.shape
        Ho = (H + 2 * p - f) // s + 1
        Wo = (W + 2 * p - f) // s + 1
        K = f * f * C

        # ---- glue: NCHW -> NHWC (bf16), zero-pad, im2col ((fh, fw, Cin)). ---
        # TODO(synk): replace with in-kernel tap streaming (see header note).
        x = jnp.transpose(x_nchw.astype(jnp.bfloat16), (0, 2, 3, 1))
        xp = jnp.pad(x, ((0, 0), (p, p), (p, p), (0, 0)))
        cols = []
        for i in range(f):
            for j in range(f):
                cols.append(xp[:, i:i + s * Ho:s, j:j + s * Wo:s, :])
        patches = jnp.concatenate(cols, axis=-1)            # (N,Ho,Wo,K) bf16
        patches = patches.reshape(N * Ho * Wo, K)

        # ---- weights: fold BN scale, pad Cout lane-dense, cast to bf16. -----
        # (Cout,Cin,fh,fw) -> (fh,fw,Cin,Cout) -> (K, Cout)
        w_mat = jnp.transpose(self.weight, (2, 3, 1, 0)).reshape(K, self.ch_out)
        scale = self.gamma / jnp.sqrt(self.running_var + self.eps)   # (Cout,)
        shift = self.beta - self.running_mean * scale                # (Cout,)
        w_scaled = w_mat * scale[None, :]                            # f32

        Coutp = ((self.ch_out + 127) // 128) * 128
        if Coutp != self.ch_out:
            w_scaled = jnp.pad(w_scaled, ((0, 0), (0, Coutp - self.ch_out)))
            shift = jnp.pad(shift, (0, Coutp - self.ch_out))
        w_bf16 = w_scaled.astype(jnp.bfloat16)
        shift = shift.reshape(1, Coutp).astype(jnp.float32)

        # ---- fused matmul + BN shift + activation (Pallas). -----------------
        out = _fused_matmul_bn_act(patches, w_bf16, shift, self.act)
        out = out[:, :self.ch_out].reshape(N, Ho, Wo, self.ch_out)
        return jnp.transpose(out, (0, 3, 1, 2))              # back to NCHW


# ---------------------------------- main -------------------------------------
if __name__ == "__main__":
    key = jax.random.PRNGKey(0)
    kx, kp = jax.random.split(key)

    N, Cin, H, W = 2, 4, 16, 16
    Cout, f, stride = 8, 3, 1
    x = jax.random.normal(kx, (N, Cin, H, W), jnp.float32)

    layer = ConvNormLayerPallas(Cin, Cout, f, stride, act="relu", key=kp)
    y = jax.block_until_ready(layer(x))

    # Reference check: XLA conv + folded BN + relu, all in f32.
    ref = jax.lax.conv_general_dilated(
        x, layer.weight, window_strides=(stride, stride),
        padding=[(layer.pad, layer.pad)] * 2,
        dimension_numbers=("NCHW", "OIHW", "NCHW"))
    sc = layer.gamma / jnp.sqrt(layer.running_var + layer.eps)
    sh = layer.beta - layer.running_mean * sc
    ref = jnp.maximum(ref * sc[None, :, None, None] + sh[None, :, None, None],
                      0.0)
    assert y.shape == ref.shape and y.dtype == ref.dtype
    # Tolerance loosened vs the f32 reference because matmul operands are bf16
    # (accumulation stays f32).
    assert jnp.allclose(y, ref, atol=3e-2, rtol=3e-2), float(
        jnp.max(jnp.abs(y - ref)))

    print("KERNEL_OK")
</pallas_src>

<mosaic_0001>
module attributes {stable_mosaic.version = 11 : i64} {
  func.func @_matmul_bn_act_kernel(%arg0: i32, %arg1: i32, %arg2: i32, %arg3: memref<512x36xbf16, #tpu.memory_space<vmem>>, %arg4: memref<36x128xbf16, #tpu.memory_space<vmem>>, %arg5: memref<1x128xf32, #tpu.memory_space<vmem>>, %arg6: memref<512x128xf32, #tpu.memory_space<vmem>>, %arg7: memref<512x128xf32, #tpu.memory_space<vmem>>) attributes {dimension_semantics = [#tpu.dimension_semantics<parallel>, #tpu.dimension_semantics<parallel>, #tpu.dimension_semantics<arbitrary>], iteration_bounds = array<i64: 1, 1, 1>, scalar_prefetch = 0 : i64, scratch_operands = 1 : i64, tpu.core_type = #tpu.core_type<tc>, window_params = [{transform_indices = @transform_0, window_bounds = array<i64: 512, 36>}, {transform_indices = @transform_1, window_bounds = array<i64: 36, 128>}, {transform_indices = @transform_2, window_bounds = array<i64: 1, 128>}, {transform_indices = @transform_3, window_bounds = array<i64: 512, 128>}]} {
    %c0_i32 = arith.constant 0 : i32
    %0 = arith.cmpi eq, %arg2, %c0_i32 : i32
    %1 = arith.extui %0 : i1 to i32
    %c0_i32_0 = arith.constant 0 : i32
    %2 = arith.cmpi ne, %1, %c0_i32_0 : i32
    scf.if %2 {
      %cst_10 = arith.constant 0.000000e+00 : f32
      %12 = vector.broadcast %cst_10 : f32 to vector<512x128xf32>
      %c0_11 = arith.constant 0 : index
      %c0_12 = arith.constant 0 : index
      %13 = vector.load %arg7[%c0_11, %c0_12] : memref<512x128xf32, #tpu.memory_space<vmem>>, vector<512x128xf32>
      tpu.vector_store %arg7[%c0_11, %c0_12], %12 {strides = array<i32>} : memref<512x128xf32, #tpu.memory_space<vmem>>, vector<512x128xf32>,
    } else {
    }
    %c0 = arith.constant 0 : index
    %c0_1 = arith.constant 0 : index
    %3 = vector.load %arg7[%c0, %c0_1] : memref<512x128xf32, #tpu.memory_space<vmem>>, vector<512x128xf32>
    %c0_2 = arith.constant 0 : index
    %c0_3 = arith.constant 0 : index
    %4 = vector.load %arg3[%c0_2, %c0_3] : memref<512x36xbf16, #tpu.memory_space<vmem>>, vector<512x36xbf16>
    %c0_4 = arith.constant 0 : index
    %c0_5 = arith.constant 0 : index
    %5 = vector.load %arg4[%c0_4, %c0_5] : memref<36x128xbf16, #tpu.memory_space<vmem>>, vector<36x128xbf16>
    %cst = arith.constant dense<0.000000e+00> : vector<512x128xf32>
    %6 = tpu.matmul %4, %5, %cst {dimension_numbers = #tpu.dot_dimension_numbers<[1], [0], [0], [1], [0, 0, 1, 1], [], []>} : vector<512x36xbf16>, vector<36x128xbf16>, vector<512x128xf32> -> vector<512x128xf32>
    %7 = arith.addf %3, %6 : vector<512x128xf32>
    %c0_6 = arith.constant 0 : index
    %c0_7 = arith.constant 0 : index
    %8 = vector.load %arg7[%c0_6, %c0_7] : memref<512x128xf32, #tpu.memory_space<vmem>>, vector<512x128xf32>
    tpu.vector_store %arg7[%c0_6, %c0_7], %7 {strides = array<i32>} : memref<512x128xf32, #tpu.memory_space<vmem>>, vector<512x128xf32>,
    %c0_i32_8 = arith.constant 0 : i32
    %9 = arith.cmpi eq, %arg2, %c0_i32_8 : i32
    %10 = arith.extui %9 : i1 to i32
    %c0_i32_9 = arith.constant 0 : i32
    %11 = arith.cmpi ne, %10, %c0_i32_9 : i32
    scf.if %11 {
      %c0_10 = arith.constant 0 : index
      %c0_11 = arith.constant 0 : index
      %12 = vector.load %arg7[%c0_10, %c0_11] : memref<512x128xf32, #tpu.memory_space<vmem>>, vector<512x128xf32>
      %c0_12 = arith.constant 0 : index
      %c0_13 = arith.constant 0 : index
      %13 = vector.load %arg5[%c0_12, %c0_13] : memref<1x128xf32, #tpu.memory_space<vmem>>, vector<1x128xf32>
      %14 = vector.broadcast %13 : vector<1x128xf32> to vector<512x128xf32>
      %15 = arith.addf %12, %14 : vector<512x128xf32>
      %cst_14 = arith.constant 0.000000e+00 : f32
      %16 = vector.broadcast %cst_14 : f32 to vector<512x128xf32>
      %17 = arith.maximumf %15, %16 : vector<512x128xf32>
      %c0_15 = arith.constant 0 : index
      %c0_16 = arith.constant 0 : index
      %18 = vector.load %arg6[%c0_15, %c0_16] : memref<512x128xf32, #tpu.memory_space<vmem>>, vector<512x128xf32>
      tpu.vector_store %arg6[%c0_15, %c0_16], %17 {strides = array<i32>} : memref<512x128xf32, #tpu.memory_space<vmem>>, vector<512x128xf32>,
    } else {
    }
    return
  }
  func.func @transform_0(%arg0: i32, %arg1: i32, %arg2: i32) -> (i32, i32) {
    %c0_i32 = arith.constant 0 : i32
    return %arg0, %arg2 : i32, i32
  }
  func.func @transform_1(%arg0: i32, %arg1: i32, %arg2: i32) -> (i32, i32) {
    %c0_i32 = arith.constant 0 : i32
    return %arg2, %arg1 : i32, i32
  }
  func.func @transform_2(%arg0: i32, %arg1: i32, %arg2: i32) -> (i32, i32) {
    %c0_i32 = arith.constant 0 : i32
    %c0_i32_0 = arith.constant 0 : i32
    return %c0_i32, %arg1 : i32, i32
  }
  func.func @transform_3(%arg0: i32, %arg1: i32, %arg2: i32) -> (i32, i32) {
    %c0_i32 = arith.constant 0 : i32
    return %arg0, %arg1 : i32, i32
  }
}

</mosaic_0001>

<bundles_post_ra>
// kernel: tpu_custom_call.1
= control target key start
LH: loop header
LB: loop body
LE: loop exit
PB: predicated region body
PF: predicated region fallthrough
CT: control target
= control target key end

     0   :  { %vm489_vm0 = vcmask 1041408   ;;  %vm392_vm1 = vcmask 293888   ;;  %s1665_s0 = inlined_call_operand.vmem [shape: bf16[512,36], index: 0, kind: input, shape index: {}]   ;;  %s1666_s1 = inlined_call_operand.vmem [shape: bf16[36,128], index: 1, kind: input, shape index: {}]   ;;  %s1667_s2 = inlined_call_operand.vmem [shape: f32[1,128], index: 2, kind: input, shape index: {}]   ;;  %s1668_s3 = inlined_call_operand.hbm [shape: f32[512,128], index: 3, kind: output, shape index: {}]  }
   0x1   :  { %v1376_v0 = vld [vmem:[%s1666_s1 + $0x10] ss:$0 sps:$4 sm:$0x33]   ;;  %v1377_v1 = vld [vmem:[%s1666_s1 + $0x8] sm:$0xff]   ;;  %v1378_v3 = vld [vmem:[%s1666_s1] sm:$0xff]  }
   0x2   :  { %1371 = vmatprep.subr.msk.bf16.mxu0 %vm489_vm0, %v1376_v0  ;;  %1372 = vmatprep.subr.msk.bf16.mxu1 %vm489_vm0, %v1376_v0  ;;  %v491_v2 = vsel %vm489_vm0, %v1376_v0, 0  ;;  %v1379_v4 = vld [vmem:[%s1665_s0] sm:$0xff]   ;;  %v1381_v6 = vld [vmem:[%s1665_s0 + $0x8] sm:$0xff]   ;;  %v1383_v8 = vld [vmem:[%s1665_s0 + $0x10] sm:$0xff]  }
   0x3   :  { %1296 = vmatpush3.bf16.msra.mxu0 %v491_v2  ;;  %1368 = vmatpush3.bf16.msra.mxu1 %v491_v2  ;;  %v1380_v5 = vld [vmem:[%s1665_s0 + $0x80] sm:$0xff]   ;;  %v1382_v7 = vld [vmem:[%s1665_s0 + $0x88] sm:$0xff]   ;;  %v1384_v9 = vld [vmem:[%s1665_s0 + $0x90] sm:$0xff]  }
   0x4   :  { %1297 = vmatprep.subr.bf16.mxu0 %v1377_v1  ;;  %1366 = vmatprep.subr.bf16.mxu1 %v1377_v1  ;;  %v1385_v10 = vld [vmem:[%s1665_s0 + $0x18] sm:$0xff]   ;;  %v1387_v12 = vld [vmem:[%s1665_s0 + $0x20] sm:$0xff]   ;;  %v1389_v14 = vld [vmem:[%s1665_s0 + $0x28] sm:$0xff]  }
   0x5   :  { %1301 = vmatprep.mubr.msk.bf16.mxu0 %vm392_vm1, %v1379_v4  ;;  %1333 = vmatprep.mubr.msk.bf16.mxu1 %vm392_vm1, %v1380_v5  ;;  %v1386_v11 = vld [vmem:[%s1665_s0 + $0x98] sm:$0xff]   ;;  %v1388_v13 = vld [vmem:[%s1665_s0 + $0xa0] sm:$0xff]   ;;  %v1390_v15 = vld [vmem:[%s1665_s0 + $0xa8] sm:$0xff]  }
   0x6   :  { %v1391_v16 = vld [vmem:[%s1665_s0 + $0x30] sm:$0xff]   ;;  %v1393_v18 = vld [vmem:[%s1665_s0 + $0x38] sm:$0xff]   ;;  %v1395_v20 = vld [vmem:[%s1665_s0 + $0x40] sm:$0xff]  }
   0x7   :  { %1298 = vmatpush3.bf16.msra.mxu0 %v1377_v1  ;;  %1369 = vmatpush3.bf16.msra.mxu1 %v1377_v1  ;;  %v1392_v17 = vld [vmem:[%s1665_s0 + $0xb0] sm:$0xff]   ;;  %v1394_v19 = vld [vmem:[%s1665_s0 + $0xb8] sm:$0xff]   ;;  %v1396_v21 = vld [vmem:[%s1665_s0 + $0xc0] sm:$0xff]  }
   0x8   :  { %1299 = vmatprep.subr.bf16.mxu0 %v1378_v3  ;;  %1367 = vmatprep.subr.bf16.mxu1 %v1378_v3 }
   0xb   :  { %1300 = vmatpush3.bf16.msra.mxu0 %v1378_v3  ;;  %1370 = vmatpush3.bf16.msra.mxu1 %v1378_v3 }
   0xe   :  { %1302 = vmatmul.mubr.msk.bf16.vlgmr.msra.gmra.mxu0 %vm392_vm1, %v1381_v6  ;;  %1334 = vmatmul.mubr.msk.bf16.vlgmr.msra.gmra.mxu1 %vm392_vm1, %v1382_v7 }
   0xf   :  { %1305 = vmatprep.mubr.msk.bf16.mxu0 %vm392_vm1, %v1383_v8  ;;  %1337 = vmatprep.mubr.msk.bf16.mxu1 %vm392_vm1, %v1384_v9 }
  0x16   :  { %1306 = vmatmul.mubr.msk.bf16.gmra.mxu0 %vm392_vm1, %v1385_v10  ;;  %1338 = vmatmul.mubr.msk.bf16.gmra.mxu1 %vm392_vm1, %v1386_v11 }
  0x17   :  { %1309 = vmatprep.mubr.msk.bf16.mxu0 %vm392_vm1, %v1387_v12  ;;  %1341 = vmatprep.mubr.msk.bf16.mxu1 %vm392_vm1, %v1388_v13 }
  0x1e   :  { %1310 = vmatmul.mubr.msk.bf16.gmra.mxu0 %vm392_vm1, %v1389_v14  ;;  %1342 = vmatmul.mubr.msk.bf16.gmra.mxu1 %vm392_vm1, %v1390_v15 }
  0x1f   :  { %1313 = vmatprep.mubr.msk.bf16.mxu0 %vm392_vm1, %v1391_v16  ;;  %1345 = vmatprep.mubr.msk.bf16.mxu1 %vm392_vm1, %v1392_v17 }
  0x20   :  { %8 = vsyncpa [#allocation4], 0  ;;  %v1397_v22 = vld [vmem:[%s1665_s0 + $0x48] sm:$0xff]   ;;  %v1399_v24 = vld [vmem:[%s1665_s0 + $0x50] sm:$0xff]  }
  0x21   :  { %v1398_v23 = vld [vmem:[%s1665_s0 + $0xc8] sm:$0xff]   ;;  %v1400_v25 = vld [vmem:[%s1665_s0 + $0xd0] sm:$0xff]   ;;  %v1401_v26 = vld [vmem:[%s1665_s0 + $0x58] sm:$0xff]  }
  0x22   :  { %v1402_v27 = vld [vmem:[%s1665_s0 + $0xd8] sm:$0xff]   ;;  %v1403_v28 = vld [vmem:[%s1665_s0 + $0x60] sm:$0xff]   ;;  %v1405_v30 = vld [vmem:[%s1665_s0 + $0x68] sm:$0xff]  }
  0x23   :  { %v1404_v29 = vld [vmem:[%s1665_s0 + $0xe0] sm:$0xff]   ;;  %v1406_v31 = vld [vmem:[%s1665_s0 + $0xe8] sm:$0xff]   ;;  %v1407_v32 = vld [vmem:[%s1665_s0 + $0x70] sm:$0xff]  }
  0x24   :  { %v1408_v33 = vld [vmem:[%s1665_s0 + $0xf0] sm:$0xff]   ;;  %v1409_v34 = vld [vmem:[%s1665_s0 + $0x78] sm:$0xff]   ;;  %v1596_v36 = vld [vmem:[%s1667_s2] ss:$0 sm:$0xff] }
  0x25   :  { %v1410_v35 = vld [vmem:[%s1665_s0 + $0xf8] sm:$0xff]   ;;  %s1433_s0 = smov [#allocation3]  }
  0x26   :  { %1314 = vmatmul.mubr.msk.bf16.gmra.mxu0 %vm392_vm1, %v1393_v18  ;;  %1346 = vmatmul.mubr.msk.bf16.gmra.mxu1 %vm392_vm1, %v1394_v19  ;;  %s1181_s2 = sshll.u32 %s1433_s0, 4  ;;  %s1182_s2 = int_to_ptr.vmem [resolvable:$true] %s1181_s2 }
  0x27   :  { %1317 = vmatprep.mubr.msk.bf16.mxu0 %vm392_vm1, %v1395_v20  ;;  %1349 = vmatprep.mubr.msk.bf16.mxu1 %vm392_vm1, %v1396_v21  ;;  %s1411_s27 = scalar_lea.vmem %s1182_s2, 8192  ;;  %p1416_p1 = scmp.lt.s32.totalorder %s1182_s2, %s1182_s2 }
  0x28   :  { %p1412_p0 = scmp.ne.s32.totalorder %s1182_s2, %s1411_s27  ;;  %p1417_p2 = scmp.lt.s32.totalorder %s1411_s27, %s1411_s27 }
  0x2a   :  { %p1418_p3 = por %p1417_p2, %p1416_p1 }
  0x2c   :  { %p1419_p4 = pnand %p1418_p3, %p1412_p0 }
  0x2e   :  { %1318 = vmatmul.mubr.msk.bf16.gmra.mxu0 %vm392_vm1, %v1397_v22  ;;  %1350 = vmatmul.mubr.msk.bf16.gmra.mxu1 %vm392_vm1, %v1398_v23 }
  0x2f   :  { %1321 = vmatprep.mubr.msk.bf16.mxu0 %vm392_vm1, %v1399_v24  ;;  %1353 = vmatprep.mubr.msk.bf16.mxu1 %vm392_vm1, %v1400_v25 }
  0x36   :  { %1322 = vmatmul.mubr.msk.bf16.gmra.mxu0 %vm392_vm1, %v1401_v26  ;;  %1354 = vmatmul.mubr.msk.bf16.gmra.mxu1 %vm392_vm1, %v1402_v27 }
  0x37   :  { %1325 = vmatprep.mubr.msk.bf16.mxu0 %vm392_vm1, %v1403_v28  ;;  %1357 = vmatprep.mubr.msk.bf16.mxu1 %vm392_vm1, %v1404_v29 }
  0x3e   :  { %1326 = vmatmul.mubr.msk.bf16.gmra.mxu0 %vm392_vm1, %v1405_v30  ;;  %1358 = vmatmul.mubr.msk.bf16.gmra.mxu1 %vm392_vm1, %v1406_v31 }
  0x3f   :  { %1329 = vmatprep.mubr.msk.bf16.mxu0 %vm392_vm1, %v1407_v32  ;;  %1361 = vmatprep.mubr.msk.bf16.mxu1 %vm392_vm1, %v1408_v33 }
  0x46   :  { %1330 = vmatmul.mubr.msk.bf16.gmra.mxu0 %vm392_vm1, %v1409_v34  ;;  %1362 = vmatmul.mubr.msk.bf16.gmra.mxu1 %vm392_vm1, %v1410_v35 }
  0xce   :  { %v1303_v37 = vpop.f32.mrf.mxu0  ;;  %v1335_v38 = vpop.f32.mrf.mxu1 }
  0xcf   :  { %v986_v39 = vadd.f32 %v1303_v37, %v1596_v36  ;;  %v1018_v40 = vadd.f32 %v1335_v38, %v1596_v36 }
  0xd0   :  { %v527_v41 = vpop.f32.mrf.mxu0  ;;  %v655_v42 = vpop.f32.mrf.mxu1 }
  0xd1   :  { %v1050_v43 = vmax.f32 %v986_v39, 0.0  ;;  %v1082_v44 = vmax.f32 %v1018_v40, 0.0  ;;  %v984_v45 = vadd.f32 %v1596_v36, %v527_v41  ;;  %v1016_v46 = vadd.f32 %v1596_v36, %v655_v42 }
  0xd2   :  { %v1304_v47 = vpop.f32.mrf.mxu0  ;;  %v1336_v48 = vpop.f32.mrf.mxu1 }
  0xd3   :  { %1114 = vst [vmem:[#allocation3 + $0x10] sm:$0xff] %v1050_v43  ;;  %1146 = vst [vmem:[#allocation3 + $0x110] sm:$0xff] %v1082_v44  ;;  %v1048_v49 = vmax.f32 %v984_v45, 0.0  ;;  %v1080_v50 = vmax.f32 %v1016_v46, 0.0  ;;  %v987_v51 = vadd.f32 %v1304_v47, %v1596_v36  ;;  %v1019_v52 = vadd.f32 %v1336_v48, %v1596_v36 }
  0xd4   :  { %v530_v53 = vpop.f32.mrf.mxu0  ;;  %v658_v54 = vpop.f32.mrf.mxu1 }
  0xd5   :  { %1112 = vst [vmem:[#allocation3] sm:$0xff] %v1048_v49  ;;  %1144 = vst [vmem:[#allocation3 + $0x100] sm:$0xff] %v1080_v50  ;;  %v1051_v55 = vmax.f32 %v987_v51, 0.0  ;;  %v1083_v56 = vmax.f32 %v1019_v52, 0.0  ;;  %v985_v57 = vadd.f32 %v1596_v36, %v530_v53  ;;  %v1017_v58 = vadd.f32 %v1596_v36, %v658_v54 }
  0xd6   :  { %v1307_v59 = vpop.f32.mrf.mxu0  ;;  %v1339_v60 = vpop.f32.mrf.mxu1 }
  0xd7   :  { %1115 = vst [vmem:[#allocation3 + $0x18] sm:$0xff] %v1051_v55  ;;  %1147 = vst [vmem:[#allocation3 + $0x118] sm:$0xff] %v1083_v56  ;;  %v1049_v61 = vmax.f32 %v985_v57, 0.0  ;;  %v1081_v62 = vmax.f32 %v1017_v58, 0.0  ;;  %v990_v63 = vadd.f32 %v1307_v59, %v1596_v36  ;;  %v1022_v0 = vadd.f32 %v1339_v60, %v1596_v36 }
  0xd8   :  { %v543_v1 = vpop.f32.mrf.mxu0  ;;  %v671_v2 = vpop.f32.mrf.mxu1 }
  0xd9   :  { %1113 = vst [vmem:[#allocation3 + $0x8] sm:$0xff] %v1049_v61  ;;  %1145 = vst [vmem:[#allocation3 + $0x108] sm:$0xff] %v1081_v62  ;;  %v1054_v3 = vmax.f32 %v990_v63, 0.0  ;;  %v1086_v4 = vmax.f32 %v1022_v0, 0.0  ;;  %v988_v5 = vadd.f32 %v1596_v36, %v543_v1  ;;  %v1020_v6 = vadd.f32 %v1596_v36, %v671_v2 }
  0xda   :  { %v1308_v7 = vpop.f32.mrf.mxu0  ;;  %v1340_v8 = vpop.f32.mrf.mxu1 }
  0xdb   :  { %1118 = vst [vmem:[#allocation3 + $0x30] sm:$0xff] %v1054_v3  ;;  %1150 = vst [vmem:[#allocation3 + $0x130] sm:$0xff] %v1086_v4  ;;  %v1052_v9 = vmax.f32 %v988_v5, 0.0  ;;  %v1084_v10 = vmax.f32 %v1020_v6, 0.0  ;;  %v991_v11 = vadd.f32 %v1308_v7, %v1596_v36  ;;  %v1023_v12 = vadd.f32 %v1340_v8, %v1596_v36 }
  0xdc   :  { %v546_v13 = vpop.f32.mrf.mxu0  ;;  %v674_v14 = vpop.f32.mrf.mxu1 }
  0xdd   :  { %1116 = vst [vmem:[#allocation3 + $0x20] sm:$0xff] %v1052_v9  ;;  %1148 = vst [vmem:[#allocation3 + $0x120] sm:$0xff] %v1084_v10  ;;  %v1055_v15 = vmax.f32 %v991_v11, 0.0  ;;  %v1087_v16 = vmax.f32 %v1023_v12, 0.0  ;;  %v989_v17 = vadd.f32 %v1596_v36, %v546_v13  ;;  %v1021_v18 = vadd.f32 %v1596_v36, %v674_v14 }
  0xde   :  { %v1311_v19 = vpop.f32.mrf.mxu0  ;;  %v1343_v20 = vpop.f32.mrf.mxu1 }
  0xdf   :  { %1119 = vst [vmem:[#allocation3 + $0x38] sm:$0xff] %v1055_v15  ;;  %1151 = vst [vmem:[#allocation3 + $0x138] sm:$0xff] %v1087_v16  ;;  %v1053_v21 = vmax.f32 %v989_v17, 0.0  ;;  %v1085_v22 = vmax.f32 %v1021_v18, 0.0  ;;  %v994_v23 = vadd.f32 %v1311_v19, %v1596_v36  ;;  %v1026_v24 = vadd.f32 %v1343_v20, %v1596_v36 }
  0xe0   :  { %v559_v25 = vpop.f32.mrf.mxu0  ;;  %v687_v26 = vpop.f32.mrf.mxu1 }
  0xe1   :  { %1117 = vst [vmem:[#allocation3 + $0x28] sm:$0xff] %v1053_v21  ;;  %1149 = vst [vmem:[#allocation3 + $0x128] sm:$0xff] %v1085_v22  ;;  %v1058_v27 = vmax.f32 %v994_v23, 0.0  ;;  %v1090_v28 = vmax.f32 %v1026_v24, 0.0  ;;  %v992_v29 = vadd.f32 %v1596_v36, %v559_v25  ;;  %v1024_v30 = vadd.f32 %v1596_v36, %v687_v26 }
  0xe2   :  { %v1312_v31 = vpop.f32.mrf.mxu0  ;;  %v1344_v32 = vpop.f32.mrf.mxu1 }
  0xe3   :  { %1122 = vst [vmem:[#allocation3 + $0x50] sm:$0xff] %v1058_v27  ;;  %1154 = vst [vmem:[#allocation3 + $0x150] sm:$0xff] %v1090_v28  ;;  %v1056_v33 = vmax.f32 %v992_v29, 0.0  ;;  %v1088_v34 = vmax.f32 %v1024_v30, 0.0  ;;  %v995_v35 = vadd.f32 %v1312_v31, %v1596_v36  ;;  %v1027_v37 = vadd.f32 %v1344_v32, %v1596_v36 }
  0xe4   :  { %v562_v38 = vpop.f32.mrf.mxu0  ;;  %v690_v39 = vpop.f32.mrf.mxu1 }
  0xe5   :  { %1120 = vst [vmem:[#allocation3 + $0x40] sm:$0xff] %v1056_v33  ;;  %1152 = vst [vmem:[#allocation3 + $0x140] sm:$0xff] %v1088_v34  ;;  %v1059_v40 = vmax.f32 %v995_v35, 0.0  ;;  %v1091_v41 = vmax.f32 %v1027_v37, 0.0  ;;  %v993_v42 = vadd.f32 %v1596_v36, %v562_v38  ;;  %v1025_v43 = vadd.f32 %v1596_v36, %v690_v39 }
  0xe6   :  { %v1315_v44 = vpop.f32.mrf.mxu0  ;;  %v1347_v45 = vpop.f32.mrf.mxu1 }
  0xe7   :  { %1123 = vst [vmem:[#allocation3 + $0x58] sm:$0xff] %v1059_v40  ;;  %1155 = vst [vmem:[#allocation3 + $0x158] sm:$0xff] %v1091_v41  ;;  %v1057_v46 = vmax.f32 %v993_v42, 0.0  ;;  %v1089_v47 = vmax.f32 %v1025_v43, 0.0  ;;  %v998_v48 = vadd.f32 %v1315_v44, %v1596_v36  ;;  %v1030_v49 = vadd.f32 %v1347_v45, %v1596_v36 }
  0xe8   :  { %v575_v50 = vpop.f32.mrf.mxu0  ;;  %v703_v51 = vpop.f32.mrf.mxu1 }
  0xe9   :  { %1121 = vst [vmem:[#allocation3 + $0x48] sm:$0xff] %v1057_v46  ;;  %1153 = vst [vmem:[#allocation3 + $0x148] sm:$0xff] %v1089_v47  ;;  %v1062_v52 = vmax.f32 %v998_v48, 0.0  ;;  %v1094_v53 = vmax.f32 %v1030_v49, 0.0  ;;  %v996_v54 = vadd.f32 %v1596_v36, %v575_v50  ;;  %v1028_v55 = vadd.f32 %v1596_v36, %v703_v51 }
  0xea   :  { %v1316_v56 = vpop.f32.mrf.mxu0  ;;  %v1348_v57 = vpop.f32.mrf.mxu1 }
  0xeb   :  { %1126 = vst [vmem:[#allocation3 + $0x70] sm:$0xff] %v1062_v52  ;;  %1158 = vst [vmem:[#allocation3 + $0x170] sm:$0xff] %v1094_v53  ;;  %v1060_v58 = vmax.f32 %v996_v54, 0.0  ;;  %v1092_v59 = vmax.f32 %v1028_v55, 0.0  ;;  %v999_v60 = vadd.f32 %v1316_v56, %v1596_v36  ;;  %v1031_v61 = vadd.f32 %v1348_v57, %v1596_v36 }
  0xec   :  { %v578_v62 = vpop.f32.mrf.mxu0  ;;  %v706_v63 = vpop.f32.mrf.mxu1 }
  0xed   :  { %1124 = vst [vmem:[#allocation3 + $0x60] sm:$0xff] %v1060_v58  ;;  %1156 = vst [vmem:[#allocation3 + $0x160] sm:$0xff] %v1092_v59  ;;  %v1063_v0 = vmax.f32 %v999_v60, 0.0  ;;  %v1095_v1 = vmax.f32 %v1031_v61, 0.0  ;;  %v997_v2 = vadd.f32 %v1596_v36, %v578_v62  ;;  %v1029_v3 = vadd.f32 %v1596_v36, %v706_v63 }
  0xee   :  { %v1319_v4 = vpop.f32.mrf.mxu0  ;;  %v1351_v5 = vpop.f32.mrf.mxu1 }
  0xef   :  { %1127 = vst [vmem:[#allocation3 + $0x78] sm:$0xff] %v1063_v0  ;;  %1159 = vst [vmem:[#allocation3 + $0x178] sm:$0xff] %v1095_v1  ;;  %v1061_v6 = vmax.f32 %v997_v2, 0.0  ;;  %v1093_v7 = vmax.f32 %v1029_v3, 0.0  ;;  %v1002_v8 = vadd.f32 %v1319_v4, %v1596_v36  ;;  %v1034_v9 = vadd.f32 %v1351_v5, %v1596_v36 }
  0xf0   :  { %v591_v10 = vpop.f32.mrf.mxu0  ;;  %v719_v11 = vpop.f32.mrf.mxu1 }
  0xf1   :  { %1125 = vst [vmem:[#allocation3 + $0x68] sm:$0xff] %v1061_v6  ;;  %1157 = vst [vmem:[#allocation3 + $0x168] sm:$0xff] %v1093_v7  ;;  %v1066_v12 = vmax.f32 %v1002_v8, 0.0  ;;  %v1098_v13 = vmax.f32 %v1034_v9, 0.0  ;;  %v1000_v14 = vadd.f32 %v1596_v36, %v591_v10  ;;  %v1032_v15 = vadd.f32 %v1596_v36, %v719_v11 }
  0xf2   :  { %v1320_v16 = vpop.f32.mrf.mxu0  ;;  %v1352_v17 = vpop.f32.mrf.mxu1 }
  0xf3   :  { %1130 = vst [vmem:[#allocation3 + $0x90] sm:$0xff] %v1066_v12  ;;  %1162 = vst [vmem:[#allocation3 + $0x190] sm:$0xff] %v1098_v13  ;;  %v1064_v18 = vmax.f32 %v1000_v14, 0.0  ;;  %v1096_v19 = vmax.f32 %v1032_v15, 0.0  ;;  %v1003_v20 = vadd.f32 %v1320_v16, %v1596_v36  ;;  %v1035_v21 = vadd.f32 %v1352_v17, %v1596_v36 }
  0xf4   :  { %v594_v22 = vpop.f32.mrf.mxu0  ;;  %v722_v23 = vpop.f32.mrf.mxu1 }
  0xf5   :  { %1128 = vst [vmem:[#allocation3 + $0x80] sm:$0xff] %v1064_v18  ;;  %1160 = vst [vmem:[#allocation3 + $0x180] sm:$0xff] %v1096_v19  ;;  %v1067_v24 = vmax.f32 %v1003_v20, 0.0  ;;  %v1099_v25 = vmax.f32 %v1035_v21, 0.0  ;;  %v1001_v26 = vadd.f32 %v1596_v36, %v594_v22  ;;  %v1033_v27 = vadd.f32 %v1596_v36, %v722_v23 }
  0xf6   :  { %v1323_v28 = vpop.f32.mrf.mxu0  ;;  %v1355_v29 = vpop.f32.mrf.mxu1 }
  0xf7   :  { %1131 = vst [vmem:[#allocation3 + $0x98] sm:$0xff] %v1067_v24  ;;  %1163 = vst [vmem:[#allocation3 + $0x198] sm:$0xff] %v1099_v25  ;;  %v1065_v30 = vmax.f32 %v1001_v26, 0.0  ;;  %v1097_v31 = vmax.f32 %v1033_v27, 0.0  ;;  %v1006_v32 = vadd.f32 %v1323_v28, %v1596_v36  ;;  %v1038_v33 = vadd.f32 %v1355_v29, %v1596_v36 }
  0xf8   :  { %v607_v34 = vpop.f32.mrf.mxu0  ;;  %v735_v35 = vpop.f32.mrf.mxu1 }
  0xf9   :  { %1129 = vst [vmem:[#allocation3 + $0x88] sm:$0xff] %v1065_v30  ;;  %1161 = vst [vmem:[#allocation3 + $0x188] sm:$0xff] %v1097_v31  ;;  %v1070_v37 = vmax.f32 %v1006_v32, 0.0  ;;  %v1102_v38 = vmax.f32 %v1038_v33, 0.0  ;;  %v1004_v39 = vadd.f32 %v1596_v36, %v607_v34  ;;  %v1036_v40 = vadd.f32 %v1596_v36, %v735_v35 }
  0xfa   :  { %v1324_v41 = vpop.f32.mrf.mxu0  ;;  %v1356_v42 = vpop.f32.mrf.mxu1 }
  0xfb   :  { %1134 = vst [vmem:[#allocation3 + $0xb0] sm:$0xff] %v1070_v37  ;;  %1166 = vst [vmem:[#allocation3 + $0x1b0] sm:$0xff] %v1102_v38  ;;  %v1068_v43 = vmax.f32 %v1004_v39, 0.0  ;;  %v1100_v44 = vmax.f32 %v1036_v40, 0.0  ;;  %v1007_v45 = vadd.f32 %v1324_v41, %v1596_v36  ;;  %v1039_v46 = vadd.f32 %v1356_v42, %v1596_v36 }
  0xfc   :  { %v610_v47 = vpop.f32.mrf.mxu0  ;;  %v738_v48 = vpop.f32.mrf.mxu1 }
  0xfd   :  { %1132 = vst [vmem:[#allocation3 + $0xa0] sm:$0xff] %v1068_v43  ;;  %1164 = vst [vmem:[#allocation3 + $0x1a0] sm:$0xff] %v1100_v44  ;;  %v1071_v49 = vmax.f32 %v1007_v45, 0.0  ;;  %v1103_v50 = vmax.f32 %v1039_v46, 0.0  ;;  %v1005_v51 = vadd.f32 %v1596_v36, %v610_v47  ;;  %v1037_v52 = vadd.f32 %v1596_v36, %v738_v48 }
  0xfe   :  { %v1327_v53 = vpop.f32.mrf.mxu0  ;;  %v1359_v54 = vpop.f32.mrf.mxu1 }
  0xff   :  { %1135 = vst [vmem:[#allocation3 + $0xb8] sm:$0xff] %v1071_v49  ;;  %1167 = vst [vmem:[#allocation3 + $0x1b8] sm:$0xff] %v1103_v50  ;;  %v1069_v55 = vmax.f32 %v1005_v51, 0.0  ;;  %v1101_v56 = vmax.f32 %v1037_v52, 0.0  ;;  %v1010_v57 = vadd.f32 %v1327_v53, %v1596_v36  ;;  %v1042_v58 = vadd.f32 %v1359_v54, %v1596_v36 }
 0x100   :  { %v623_v59 = vpop.f32.mrf.mxu0  ;;  %v751_v60 = vpop.f32.mrf.mxu1 }
 0x101   :  { %1133 = vst [vmem:[#allocation3 + $0xa8] sm:$0xff] %v1069_v55  ;;  %1165 = vst [vmem:[#allocation3 + $0x1a8] sm:$0xff] %v1101_v56  ;;  %v1074_v61 = vmax.f32 %v1010_v57, 0.0  ;;  %v1106_v62 = vmax.f32 %v1042_v58, 0.0  ;;  %v1008_v63 = vadd.f32 %v1596_v36, %v623_v59  ;;  %v1040_v0 = vadd.f32 %v1596_v36, %v751_v60 }
 0x102   :  { %v1328_v1 = vpop.f32.mrf.mxu0  ;;  %v1360_v2 = vpop.f32.mrf.mxu1 }
 0x103   :  { %1138 = vst [vmem:[#allocation3 + $0xd0] sm:$0xff] %v1074_v61  ;;  %1170 = vst [vmem:[#allocation3 + $0x1d0] sm:$0xff] %v1106_v62  ;;  %v1072_v3 = vmax.f32 %v1008_v63, 0.0  ;;  %v1104_v4 = vmax.f32 %v1040_v0, 0.0  ;;  %v1011_v5 = vadd.f32 %v1328_v1, %v1596_v36  ;;  %v1043_v6 = vadd.f32 %v1360_v2, %v1596_v36 }
 0x104   :  { %v626_v7 = vpop.f32.mrf.mxu0  ;;  %v754_v8 = vpop.f32.mrf.mxu1 }
 0x105   :  { %1136 = vst [vmem:[#allocation3 + $0xc0] sm:$0xff] %v1072_v3  ;;  %1168 = vst [vmem:[#allocation3 + $0x1c0] sm:$0xff] %v1104_v4  ;;  %v1075_v9 = vmax.f32 %v1011_v5, 0.0  ;;  %v1107_v10 = vmax.f32 %v1043_v6, 0.0  ;;  %v1009_v11 = vadd.f32 %v1596_v36, %v626_v7  ;;  %v1041_v12 = vadd.f32 %v1596_v36, %v754_v8 }
 0x106   :  { %v1331_v13 = vpop.f32.mrf.mxu0  ;;  %v1363_v14 = vpop.f32.mrf.mxu1 }
 0x107   :  { %1139 = vst [vmem:[#allocation3 + $0xd8] sm:$0xff] %v1075_v9  ;;  %1171 = vst [vmem:[#allocation3 + $0x1d8] sm:$0xff] %v1107_v10  ;;  %v1073_v15 = vmax.f32 %v1009_v11, 0.0  ;;  %v1105_v16 = vmax.f32 %v1041_v12, 0.0  ;;  %v1014_v17 = vadd.f32 %v1331_v13, %v1596_v36  ;;  %v1046_v18 = vadd.f32 %v1363_v14, %v1596_v36 }
 0x108   :  { %v639_v19 = vpop.f32.mrf.mxu0  ;;  %v767_v20 = vpop.f32.mrf.mxu1 }
 0x109   :  { %1137 = vst [vmem:[#allocation3 + $0xc8] sm:$0xff] %v1073_v15  ;;  %1169 = vst [vmem:[#allocation3 + $0x1c8] sm:$0xff] %v1105_v16  ;;  %v1078_v21 = vmax.f32 %v1014_v17, 0.0  ;;  %v1110_v22 = vmax.f32 %v1046_v18, 0.0  ;;  %v1012_v23 = vadd.f32 %v1596_v36, %v639_v19  ;;  %v1044_v24 = vadd.f32 %v1596_v36, %v767_v20 }
 0x10a   :  { %v1332_v25 = vpop.f32.mrf.mxu0  ;;  %v1364_v26 = vpop.f32.mrf.mxu1 }
 0x10b   :  { %1142 = vst [vmem:[#allocation3 + $0xf0] sm:$0xff] %v1078_v21  ;;  %1174 = vst [vmem:[#allocation3 + $0x1f0] sm:$0xff] %v1110_v22  ;;  %v1076_v27 = vmax.f32 %v1012_v23, 0.0  ;;  %v1108_v28 = vmax.f32 %v1044_v24, 0.0  ;;  %v1015_v29 = vadd.f32 %v1332_v25, %v1596_v36  ;;  %v1047_v30 = vadd.f32 %v1364_v26, %v1596_v36 }
 0x10c   :  { %v642_v31 = vpop.f32.mrf.mxu0  ;;  %v770_v32 = vpop.f32.mrf.mxu1 }
 0x10d   :  { %1140 = vst [vmem:[#allocation3 + $0xe0] sm:$0xff] %v1076_v27  ;;  %1172 = vst [vmem:[#allocation3 + $0x1e0] sm:$0xff] %v1108_v28  ;;  %v1079_v33 = vmax.f32 %v1015_v29, 0.0  ;;  %v1111_v34 = vmax.f32 %v1047_v30, 0.0  ;;  %v1013_v35 = vadd.f32 %v1596_v36, %v642_v31  ;;  %v1045_v37 = vadd.f32 %v1596_v36, %v770_v32 }
 0x10f   :  { %1143 = vst [vmem:[#allocation3 + $0xf8] sm:$0xff] %v1079_v33  ;;  %1175 = vst [vmem:[#allocation3 + $0x1f8] sm:$0xff] %v1111_v34  ;;  %v1077_v38 = vmax.f32 %v1013_v35, 0.0  ;;  %v1109_v39 = vmax.f32 %v1045_v37, 0.0 }
 0x111   :  { %1141 = vst [vmem:[#allocation3 + $0xe8] sm:$0xff] %v1077_v38  ;;  %1173 = vst [vmem:[#allocation3 + $0x1e8] sm:$0xff] %v1109_v39 }
 0x112   :  { %1422 = shalt.err (!%p1419_p4)
}
 0x113   :  { %s1434_s28 = smov 128   ;;  %s1435_s29 = smov 8  }
 0x114   :  { %1187 = dma.vmem_to_hbm [thread:$0]  %s1182_s2, 8192, %s1668_s3, [#allocation4], %s1434_s28, %s1434_s28, %s1435_s29  }
 0x115   :  { %1431 = dma.done.wait [#allocation4], 8192  }
 0x116   :  { %1432 = vsyncadd [#allocation4], 4294959104 }
 0x117   :  { %1191 = vsyncpa [#allocation4], 1 }

</bundles_post_ra>
